<compile_context>
chip_gen: v7x
topology: tpu7x:2x2x1
jax: 0.10.0
libtpu: 0.0.40
codegen_flags: <defaults>
</compile_context>

<pallas_src>
import functools

import jax
import jax.numpy as jnp
from jax.experimental import pallas as pl
from jax.experimental.pallas import tpu as pltpu


def _cga_kernel(lengths_ref,                       # SMEM scalar-prefetch, (B,) int32
                x_ref, xg_ref, wd_ref, wg_ref, bias_ref, expand_ref,
                out_x_ref, out_attn_ref,
                *, block_b):
    bidx = pl.program_id(0)
    S = x_ref.shape[1]
    C = wd_ref.shape[0]

    # Hoisted once per grid step and reused across the block_b rows (JAX does not
    # CSE broadcast_in_dim, so keep these out of the row loop).
    wd = wd_ref[...]            # (C, Dd)
    wg = wg_ref[...]            # (C, Dg)
    bias = bias_ref[...]        # (C, 1)
    expand = expand_ref[...]    # (C, Dd) 0/1 block-expansion matrix
    seq_idx = jax.lax.broadcasted_iota(jnp.int32, (C, S), 1)   # lane (sequence) index

    def row_body(i, carry):
        length = lengths_ref[bidx * block_b + i]
        x_i = x_ref[i]                                   # (S, Dd)
        xg_i = xg_ref[i]                                 # (S, Dg)

        # Linear over concat(x, x_graph), produced directly lane-dense as (C, S):
        #   logits = Wd @ x^T + Wg @ xg^T + b     (canonical a @ b.T MXU form).
        logits = (
            jax.lax.dot_general(wd, x_i, (((1,), (1,)), ((), ())),
                                preferred_element_type=jnp.float32)
            + jax.lax.dot_general(wg, xg_i, (((1,), (1,)), ((), ())),
                                  preferred_element_type=jnp.float32)
            + bias)                                      # (C, S)

        # ELU (alpha=1).  exp(min(x,0)) avoids the discarded +inf on the positive
        # branch; Dropout is identity at inference.
        act = jnp.where(logits > 0, logits,
                        jnp.exp(jnp.minimum(logits, 0.0)) - 1.0)

        # Mask padding positions, softmax along the sequence (lane) axis.
        att = jnp.where(seq_idx < length, act, -jnp.inf)
        m = jnp.maximum(jnp.max(att, axis=-1, keepdims=True), -3e38)  # guard len==0
        e = jnp.exp(att - m)                                          # (C, S)
        den = jnp.maximum(jnp.sum(e, axis=-1, keepdims=True), 1e-30)  # guard len==0
        # NOTE: pl.reciprocal(approx=True) would move this to the EUP slot but costs
        # ~1e-3 relative error; kept exact to stay bit-close to the reference.
        p_t = e * pl.reciprocal(den)                                  # (C, S)

        # Attention is already lane-dense (C, S): single full-width store.
        out_attn_ref[i] = p_t.astype(out_attn_ref.dtype)

        # scale[s, d] = p_t[d // category_dims, s] via a trans_a MXU dot with the
        # block-expansion matrix (exact: expand is 0/1, one nonzero term per output).
        scale = jax.lax.dot_general(p_t, expand, (((0,), (0,)), ((), ())),
                                    preferred_element_type=jnp.float32)  # (S, Dd)

        # Single full-width, lane-dense store per row.
        out_x_ref[i] = (x_i * scale).astype(out_x_ref.dtype)
        return carry

    # Unrolled fori_loop bounds per-row live ranges (a static Python loop does not)
    # while keeping the body visible to the LLO scheduler.
    jax.lax.fori_loop(0, block_b, row_body, 0, unroll=True)


def _vmem_capacity_bytes():
    """Physical VMEM per core; falls back to a conservative (v7x-class) value."""
    try:
        info = pltpu.get_tpu_info()
        cap = getattr(info, "vmem_capacity_bytes", None)
        if cap:
            return int(cap)
    except Exception:
        pass
    return 64 << 20


def _choose_block_b(B, S, Dd, Dg, C, itemsize, vmem_bytes):
    """Rows per grid step, generation-aware, against a double-buffered VMEM budget."""
    small_vmem = vmem_bytes < (100 << 20)          # v7x-class (64 MiB physical)
    budget = (20 << 20) if small_vmem else (40 << 20)
    max_block_b = 8 if small_vmem else 16
    per_row = itemsize * S * (Dd + Dg) + itemsize * S * Dd + 4 * C * S
    cap = max(1, min(B, max_block_b, budget // (2 * per_row)))
    divisors = [b for b in range(1, B + 1) if B % b == 0 and b <= cap]

    def rank(b):
        grid = B // b
        if small_vmem:
            # v7x: two TensorCores shard the 'parallel' axis -> prefer an even grid
            # length (balance), then any multi-step grid, then the largest block.
            return (grid % 2 == 0, grid >= 2, b)
        # v5e/v6e: single TC; keep grid >= 2 for pipeline overlap, then largest block.
        return (grid >= 2, b)

    return max(divisors, key=rank)


def categorical_graph_attention(x, x_graph, lengths, weight, bias, num_categories,
                                *, block_b=None, attn_dtype=jnp.float32):
    """weight: (C, D_doc + D_graph) PyTorch Linear weight; bias: (C,)."""
    B, S, Dd = x.shape
    Dg = x_graph.shape[-1]
    C = num_categories
    assert Dd % C == 0
    cd = Dd // C

    # Weights in the activation dtype (MXU-native; exact for the f32 test inputs).
    w = weight.astype(x.dtype)
    wd = w[:, :Dd]                                    # (C, Dd)
    wg = w[:, Dd:]                                    # (C, Dg)
    bias2 = bias.reshape(C, 1).astype(jnp.float32)    # (C, 1)
    expand = jnp.repeat(jnp.eye(C, dtype=jnp.float32), cd, axis=1)   # (C, Dd)

    vmem_bytes = _vmem_capacity_bytes()
    if block_b is None:
        block_b = _choose_block_b(B, S, Dd, Dg, C, jnp.dtype(x.dtype).itemsize,
                                  vmem_bytes)
    assert B % block_b == 0
    small_vmem = vmem_bytes < (100 << 20)
    vmem_limit = (40 << 20) if small_vmem else (64 << 20)

    kernel = functools.partial(_cga_kernel, block_b=block_b)

    out_x, attention = pl.pallas_call(
        kernel,
        out_shape=(
            jax.ShapeDtypeStruct((B, S, Dd), x.dtype),
            jax.ShapeDtypeStruct((B, C, S), attn_dtype),
        ),
        grid_spec=pltpu.PrefetchScalarGridSpec(
            num_scalar_prefetch=1,
            grid=(B // block_b,),
            in_specs=[
                pl.BlockSpec((block_b, S, Dd), lambda b, lens: (b, 0, 0)),
                pl.BlockSpec((block_b, S, Dg), lambda b, lens: (b, 0, 0)),
                pl.BlockSpec((C, Dd), lambda b, lens: (0, 0)),
                pl.BlockSpec((C, Dg), lambda b, lens: (0, 0)),
                pl.BlockSpec((C, 1), lambda b, lens: (0, 0)),
                pl.BlockSpec((C, Dd), lambda b, lens: (0, 0)),
            ],
            out_specs=[
                pl.BlockSpec((block_b, S, Dd), lambda b, lens: (b, 0, 0)),
                pl.BlockSpec((block_b, C, S), lambda b, lens: (b, 0, 0)),
            ],
        ),
        compiler_params=pltpu.CompilerParams(
            dimension_semantics=("parallel",),
            vmem_limit_bytes=vmem_limit,
        ),
    )(lengths.astype(jnp.int32), x, x_graph, wd, wg, bias2, expand)

    return out_x, attention


def _reference(x, x_graph, lengths, weight, bias, num_categories):
    """Pure-JAX reference reproducing the PyTorch forward (inference mode)."""
    B, S, Dd = x.shape
    cd = Dd // num_categories
    ctx = jnp.concatenate([x, x_graph], axis=-1)
    logits = ctx @ weight.T + bias
    act = jax.nn.elu(logits)                                     # ELU (expm1 form)
    att = jnp.transpose(act, (0, 2, 1))                          # (B, C, S)
    mask = jnp.arange(S)[None, None, :] < lengths[:, None, None]
    att = jnp.where(mask, att, -jnp.inf)
    p = jax.nn.softmax(att, axis=-1)
    xs = x.reshape(B, S, num_categories, cd).transpose(0, 2, 1, 3)
    out = p[..., None] * xs
    out = out.transpose(0, 2, 1, 3).reshape(B, S, Dd)
    return out, p


if __name__ == "__main__":
    # Small, module-consistent shapes.
    B, S = 2, 8
    D_doc, D_graph, C = 32, 16, 4

    key = jax.random.PRNGKey(0)
    kx, kg, kw, kb = jax.random.split(key, 4)

    x = jax.random.normal(kx, (B, S, D_doc), dtype=jnp.float32)
    x_graph = jax.random.normal(kg, (B, S, D_graph), dtype=jnp.float32)
    lengths = jnp.array([8, 5], dtype=jnp.int32)

    # Deterministic Linear(in=D_doc+D_graph, out=C) init (PyTorch-style uniform bound).
    in_dims = D_doc + D_graph
    bound = 1.0 / float(in_dims) ** 0.5
    weight = jax.random.uniform(kw, (C, in_dims), jnp.float32, -bound, bound)
    bias = jax.random.uniform(kb, (C,), jnp.float32, -bound, bound)

    out_x, attention = categorical_graph_attention(
        x, x_graph, lengths, weight, bias, C)
    out_x, attention = jax.block_until_ready((out_x, attention))

    ref_x, ref_attn = _reference(x, x_graph, lengths, weight, bias, C)
    assert out_x.shape == (B, S, D_doc)
    assert attention.shape == (B, C, S)
    assert jnp.allclose(out_x, ref_x, atol=1e-5, rtol=1e-5)
    assert jnp.allclose(attention, ref_attn, atol=1e-5, rtol=1e-5)

    print("KERNEL_OK")
</pallas_src>

<mosaic_0001>
module attributes {stable_mosaic.version = 11 : i64} {
  func.func @_cga_kernel(%arg0: i32, %arg1: memref<2xi32, #tpu.memory_space<smem>>, %arg2: memref<1x8x32xf32, #tpu.memory_space<vmem>>, %arg3: memref<1x8x16xf32, #tpu.memory_space<vmem>>, %arg4: memref<4x32xf32, #tpu.memory_space<vmem>>, %arg5: memref<4x16xf32, #tpu.memory_space<vmem>>, %arg6: memref<4x1xf32, #tpu.memory_space<vmem>>, %arg7: memref<4x32xf32, #tpu.memory_space<vmem>>, %arg8: memref<1x8x32xf32, #tpu.memory_space<vmem>>, %arg9: memref<1x4x8xf32, #tpu.memory_space<vmem>>) attributes {dimension_semantics = [#tpu.dimension_semantics<parallel>], iteration_bounds = array<i64: 2>, scalar_prefetch = 1 : i64, scratch_operands = 0 : i64, tpu.core_type = #tpu.core_type<tc>, window_params = [{transform_indices = @transform_0, window_bounds = array<i64: 1, 8, 32>}, {transform_indices = @transform_1, window_bounds = array<i64: 1, 8, 16>}, {pipeline_mode = #tpu.pipeline_mode<synchronous>, transform_indices = @transform_2, window_bounds = array<i64: 4, 32>}, {pipeline_mode = #tpu.pipeline_mode<synchronous>, transform_indices = @transform_3, window_bounds = array<i64: 4, 16>}, {pipeline_mode = #tpu.pipeline_mode<synchronous>, transform_indices = @transform_4, window_bounds = array<i64: 4, 1>}, {pipeline_mode = #tpu.pipeline_mode<synchronous>, transform_indices = @transform_5, window_bounds = array<i64: 4, 32>}, {transform_indices = @transform_6, window_bounds = array<i64: 1, 8, 32>}, {transform_indices = @transform_7, window_bounds = array<i64: 1, 4, 8>}]} {
    %c0 = arith.constant 0 : index
    %c0_0 = arith.constant 0 : index
    %0 = vector.load %arg4[%c0, %c0_0] : memref<4x32xf32, #tpu.memory_space<vmem>>, vector<4x32xf32>
    %c0_1 = arith.constant 0 : index
    %c0_2 = arith.constant 0 : index
    %1 = vector.load %arg5[%c0_1, %c0_2] : memref<4x16xf32, #tpu.memory_space<vmem>>, vector<4x16xf32>
    %c0_3 = arith.constant 0 : index
    %c0_4 = arith.constant 0 : index
    %2 = vector.load %arg6[%c0_3, %c0_4] : memref<4x1xf32, #tpu.memory_space<vmem>>, vector<4x1xf32>
    %c0_5 = arith.constant 0 : index
    %c0_6 = arith.constant 0 : index
    %3 = vector.load %arg7[%c0_5, %c0_6] : memref<4x32xf32, #tpu.memory_space<vmem>>, vector<4x32xf32>
    %4 = tpu.iota {dimensions = array<i32: 1>} : vector<4x8xi32>
    %c0_i32 = arith.constant 0 : i32
    %c1_i32 = arith.constant 1 : i32
    %5 = arith.muli %arg0, %c1_i32 : i32
    %6 = arith.addi %5, %c0_i32 : i32
    %7 = arith.index_cast %6 : i32 to index
    %8 = memref.load %arg1[%7] : memref<2xi32, #tpu.memory_space<smem>>
    %9 = arith.index_cast %c0_i32 : i32 to index
    %c0_7 = arith.constant 0 : index
    %c0_8 = arith.constant 0 : index
    %10 = vector.load %arg2[%9, %c0_7, %c0_8] : memref<1x8x32xf32, #tpu.memory_space<vmem>>, vector<1x8x32xf32>
    %11 = vector.shape_cast %10 : vector<1x8x32xf32> to vector<8x32xf32>
    %12 = arith.index_cast %c0_i32 : i32 to index
    %c0_9 = arith.constant 0 : index
    %c0_10 = arith.constant 0 : index
    %13 = vector.load %arg3[%12, %c0_9, %c0_10] : memref<1x8x16xf32, #tpu.memory_space<vmem>>, vector<1x8x16xf32>
    %14 = vector.shape_cast %13 : vector<1x8x16xf32> to vector<8x16xf32>
    %cst = arith.constant dense<0.000000e+00> : vector<4x8xf32>
    %15 = tpu.matmul %0, %11, %cst {dimension_numbers = #tpu.dot_dimension_numbers<[1], [1], [0], [0], [0, 0, 1, 0], [], []>} : vector<4x32xf32>, vector<8x32xf32>, vector<4x8xf32> -> vector<4x8xf32>
    %cst_11 = arith.constant dense<0.000000e+00> : vector<4x8xf32>
    %16 = tpu.matmul %1, %14, %cst_11 {dimension_numbers = #tpu.dot_dimension_numbers<[1], [1], [0], [0], [0, 0, 1, 0], [], []>} : vector<4x16xf32>, vector<8x16xf32>, vector<4x8xf32> -> vector<4x8xf32>
    %17 = arith.addf %15, %16 : vector<4x8xf32>
    %18 = vector.broadcast %2 : vector<4x1xf32> to vector<4x8xf32>
    %19 = arith.addf %17, %18 : vector<4x8xf32>
    %cst_12 = arith.constant 0.000000e+00 : f32
    %20 = vector.broadcast %cst_12 : f32 to vector<4x8xf32>
    %21 = arith.cmpf ogt, %19, %20 : vector<4x8xf32>
    %cst_13 = arith.constant 0.000000e+00 : f32
    %22 = vector.broadcast %cst_13 : f32 to vector<4x8xf32>
    %23 = arith.minimumf %19, %22 : vector<4x8xf32>
    %24 = math.exp %23 : vector<4x8xf32>
    %cst_14 = arith.constant 1.000000e+00 : f32
    %25 = vector.broadcast %cst_14 : f32 to vector<4x8xf32>
    %26 = arith.subf %24, %25 : vector<4x8xf32>
    %27 = arith.select %21, %19, %26 : vector<4x8xi1>, vector<4x8xf32>
    %28 = vector.broadcast %8 : i32 to vector<4x8xi32>
    %29 = arith.cmpi slt, %4, %28 : vector<4x8xi32>
    %cst_15 = arith.constant 0xFF800000 : f32
    %30 = vector.broadcast %cst_15 : f32 to vector<4x8xf32>
    %31 = arith.select %29, %27, %30 : vector<4x8xi1>, vector<4x8xf32>
    %cst_16 = arith.constant dense<0xFF800000> : vector<4xf32>
    %32 = vector.multi_reduction <maximumf>, %31, %cst_16 [1] : vector<4x8xf32> to vector<4xf32>
    %33 = vector.shape_cast %32 : vector<4xf32> to vector<4x1xf32>
    %cst_17 = arith.constant -3.000000e+38 : f32
    %34 = vector.broadcast %cst_17 : f32 to vector<4x1xf32>
    %35 = arith.maximumf %33, %34 : vector<4x1xf32>
    %36 = vector.broadcast %35 : vector<4x1xf32> to vector<4x8xf32>
    %37 = arith.subf %31, %36 : vector<4x8xf32>
    %38 = math.exp %37 : vector<4x8xf32>
    %cst_18 = arith.constant dense<0.000000e+00> : vector<4xf32>
    %39 = vector.multi_reduction <add>, %38, %cst_18 [1] : vector<4x8xf32> to vector<4xf32>
    %40 = vector.shape_cast %39 : vector<4xf32> to vector<4x1xf32>
    %cst_19 = arith.constant 1.000000e-30 : f32
    %41 = vector.broadcast %cst_19 : f32 to vector<4x1xf32>
    %42 = arith.maximumf %40, %41 : vector<4x1xf32>
    %43 = tpu.reciprocal %42 : vector<4x1xf32> -> vector<4x1xf32>
    %44 = vector.broadcast %43 : vector<4x1xf32> to vector<4x8xf32>
    %45 = arith.mulf %38, %44 : vector<4x8xf32>
    %46 = arith.index_cast %c0_i32 : i32 to index
    %c0_20 = arith.constant 0 : index
    %c0_21 = arith.constant 0 : index
    %47 = vector.load %arg9[%46, %c0_20, %c0_21] : memref<1x4x8xf32, #tpu.memory_space<vmem>>, vector<1x4x8xf32>
    %48 = vector.shape_cast %47 : vector<1x4x8xf32> to vector<4x8xf32>
    %49 = vector.shape_cast %45 : vector<4x8xf32> to vector<1x4x8xf32>
    tpu.vector_store %arg9[%46, %c0_20, %c0_21], %49 {strides = array<i32>} : memref<1x4x8xf32, #tpu.memory_space<vmem>>, vector<1x4x8xf32>,
    %cst_22 = arith.constant dense<0.000000e+00> : vector<8x32xf32>
    %50 = tpu.matmul %45, %3, %cst_22 {dimension_numbers = #tpu.dot_dimension_numbers<[0], [0], [1], [1], [0, 1, 1, 1], [], []>} : vector<4x8xf32>, vector<4x32xf32>, vector<8x32xf32> -> vector<8x32xf32>
    %51 = arith.mulf %11, %50 : vector<8x32xf32>
    %52 = arith.index_cast %c0_i32 : i32 to index
    %c0_23 = arith.constant 0 : index
    %c0_24 = arith.constant 0 : index
    %53 = vector.load %arg8[%52, %c0_23, %c0_24] : memref<1x8x32xf32, #tpu.memory_space<vmem>>, vector<1x8x32xf32>
    %54 = vector.shape_cast %53 : vector<1x8x32xf32> to vector<8x32xf32>
    %55 = vector.shape_cast %51 : vector<8x32xf32> to vector<1x8x32xf32>
    tpu.vector_store %arg8[%52, %c0_23, %c0_24], %55 {strides = array<i32>} : memref<1x8x32xf32, #tpu.memory_space<vmem>>, vector<1x8x32xf32>,
    %c1_i32_25 = arith.constant 1 : i32
    return
  }
  func.func @transform_0(%arg0: i32, %arg1: memref<2xi32, #tpu.memory_space<smem>>) -> (i32, i32, i32) {
    %c0_i32 = arith.constant 0 : i32
    %c0_i32_0 = arith.constant 0 : i32
    %c0_i32_1 = arith.constant 0 : i32
    return %arg0, %c0_i32, %c0_i32_0 : i32, i32, i32
  }
  func.func @transform_1(%arg0: i32, %arg1: memref<2xi32, #tpu.memory_space<smem>>) -> (i32, i32, i32) {
    %c0_i32 = arith.constant 0 : i32
    %c0_i32_0 = arith.constant 0 : i32
    %c0_i32_1 = arith.constant 0 : i32
    return %arg0, %c0_i32, %c0_i32_0 : i32, i32, i32
  }
  func.func @transform_2(%arg0: i32, %arg1: memref<2xi32, #tpu.memory_space<smem>>) -> (i32, i32) {
    %c0_i32 = arith.constant 0 : i32
    %c0_i32_0 = arith.constant 0 : i32
    %c0_i32_1 = arith.constant 0 : i32
    return %c0_i32, %c0_i32_0 : i32, i32
  }
  func.func @transform_3(%arg0: i32, %arg1: memref<2xi32, #tpu.memory_space<smem>>) -> (i32, i32) {
    %c0_i32 = arith.constant 0 : i32
    %c0_i32_0 = arith.constant 0 : i32
    %c0_i32_1 = arith.constant 0 : i32
    return %c0_i32, %c0_i32_0 : i32, i32
  }
  func.func @transform_4(%arg0: i32, %arg1: memref<2xi32, #tpu.memory_space<smem>>) -> (i32, i32) {
    %c0_i32 = arith.constant 0 : i32
    %c0_i32_0 = arith.constant 0 : i32
    %c0_i32_1 = arith.constant 0 : i32
    return %c0_i32, %c0_i32_0 : i32, i32
  }
  func.func @transform_5(%arg0: i32, %arg1: memref<2xi32, #tpu.memory_space<smem>>) -> (i32, i32) {
    %c0_i32 = arith.constant 0 : i32
    %c0_i32_0 = arith.constant 0 : i32
    %c0_i32_1 = arith.constant 0 : i32
    return %c0_i32, %c0_i32_0 : i32, i32
  }
  func.func @transform_6(%arg0: i32, %arg1: memref<2xi32, #tpu.memory_space<smem>>) -> (i32, i32, i32) {
    %c0_i32 = arith.constant 0 : i32
    %c0_i32_0 = arith.constant 0 : i32
    %c0_i32_1 = arith.constant 0 : i32
    return %arg0, %c0_i32, %c0_i32_0 : i32, i32, i32
  }
  func.func @transform_7(%arg0: i32, %arg1: memref<2xi32, #tpu.memory_space<smem>>) -> (i32, i32, i32) {
    %c0_i32 = arith.constant 0 : i32
    %c0_i32_0 = arith.constant 0 : i32
    %c0_i32_1 = arith.constant 0 : i32
    return %arg0, %c0_i32, %c0_i32_0 : i32, i32, i32
  }
}

</mosaic_0001>

<bundles_post_ra>
// kernel: tpu_custom_call.1
= control target key start
LH: loop header
LB: loop body
LE: loop exit
PB: predicated region body
PF: predicated region fallthrough
CT: control target
= control target key end

     0   :  { %s1428_s0 = inlined_call_operand.hbm [shape: s32[2], index: 0, kind: input, shape index: {}]   ;;  %s1429_s1 = inlined_call_operand.hbm [shape: f32[2,8,32], index: 1, kind: input, shape index: {}]   ;;  %s1430_s2 = inlined_call_operand.hbm [shape: f32[2,8,16], index: 2, kind: input, shape index: {}]   ;;  %s1431_s3 = inlined_call_operand.vmem [shape: f32[4,32], index: 3, kind: input, shape index: {}]   ;;  %s1432_s4 = inlined_call_operand.vmem [shape: f32[4,16], index: 4, kind: input, shape index: {}]   ;;  %s1433_s5 = inlined_call_operand.vmem [shape: f32[4,1], index: 5, kind: input, shape index: {}]   ;;  %s1434_s6 = inlined_call_operand.vmem [shape: f32[4,32], index: 6, kind: input, shape index: {}]   ;;  %s1435_s7 = inlined_call_operand.hbm [shape: f32[2,8,32], index: 7, kind: output, shape index: {0}]   ;;  %s1436_s8 = inlined_call_operand.hbm [shape: f32[2,4,8], index: 8, kind: output, shape index: {1}]  }
   0x1   :  { %1440 = sst [smem:[#allocation17_spill]] %s1429_s1  ;;  %s922_s29 = scalar_lea.hbm %s1428_s0, 16 }
   0x2   :  { %p923_p0 = scmp.ne.s32.totalorder %s1428_s0, %s922_s29  ;;  %p926_p1 = scmp.lt.u32.totalorder %s922_s29, %s1428_s0 }
   0x4   :  { %p928_p2 = pnand %p926_p1, %p923_p0 }
   0x6   :  { %931 = shalt.err (!%p928_p2)  }
   0x7   :  { %s1098_s12 = smov [#allocation3]  }
   0x8   :  { %15 = dma.hbm_to_smem %s1428_s0, 16, %s1098_s12, [#allocation2] }
   0x9   :  { %1064 = dma.done.wait [#allocation2], 16 }
   0xa   :  { %1065 = vsyncadd [#allocation2], 4294967280 }
   0xb   :  { %17 = sfence }
   0xc   :  { %18 = vsyncpa [#allocation5], 0 }
   0xd   :  { %20 = vsyncpa [#allocation5 + $0x1], 0 }
   0xe   :  { %21 = vsyncpa [#allocation8], 0 }
   0xf   :  { %23 = vsyncpa [#allocation8 + $0x1], 0 }
  0x10   :  { %24 = vsyncpa [#allocation6], 0 }
  0x11   :  { %26 = vsyncpa [#allocation6 + $0x1], 0 }
  0x12   :  { %27 = vsyncpa [#allocation11], 0 }
  0x13   :  { %29 = vsyncpa [#allocation11 + $0x1], 0  ;;  %s1163_s15 = smov 0   ;;  %s1165_s16 = smov 0  }
  0x14   :  { %s1167_s17 = smov 0   ;;  %s1169_s18 = smov 0  }
  0x15 LB: > { %s1184_s0 = sadd.s32 4294967295, %s1096_s18   ;;  %s809_s19 = sadd.s32 4294967294, %s1096_s18   ;;  %s1096_s18 = sphi %s1169_s18, %s1459_s18   ;;  %s1092_s17 = sphi %s1167_s17, %s1458_s17   ;;  %s1088_s16 = sphi %s1165_s16, %s1457_s16   ;;  %s1084_s15 = sphi %s1163_s15, %s1456_s15  }
  0x16   : > { %s1188_s20 = sadd.s32 1, %s1096_s18   ;;  %s42_s21 = sadd.s32 1, %s1092_s17 }
  0x17   : > { %s39_s22 = ssub.s32 %s1096_s18, %s1188_s20  ;;  %p49_p3 = scmp.ne.s32.totalorder %s1092_s17, %s1088_s16 }
  0x18   : > { %p40_p4 = scmp.eq.s32.totalorder %s39_s22, 0  ;;  %p50_p5 = scmp.eq.s32.totalorder %s1096_s18, 0 }
  0x19   : > { %p55_p6 = scmp.ne.s32.totalorder %s1088_s16, %s1084_s15  ;;  %p56_p7 = scmp.eq.s32.totalorder %s1184_s0, 0 }
  0x1a   : > { %s1200_s23 = scalar_select %p40_p4, %s1092_s17, %s42_s21  }
  0x1b   : > { %p1202_p8 = por %p50_p5, %p49_p3  ;;  %p1206_p9 = por %p56_p7, %p55_p6 }
  0x1c   : > { %p189_p10 = scmp.eq.s32.totalorder %s1184_s0, 1  ;;  %p195_p11 = scmp.eq.s32.totalorder %s809_s19, 1 }
  0x1d   : > { %s1442_s25 = scalar_select %p1206_p9, 1, 0 }
  0x1e   : > { %p877_p13 = scmp.lt.s32.totalorder %s1096_s18, 2  ;;  %p1213_p0 = por %p189_p10, %p49_p3 }
  0x1f   : > { %p1217_p1 = por %p195_p11, %p55_p6  ;;  %s1222_s28 = sand.u32 1, %s1092_s17  }
  0x20   : > { %s1443_s26 = scalar_select %p1213_p0, 1, 0 }
  0x21   : > { %s1444_s27 = scalar_select %p1217_p1, 1, 0 }
  0x22   : > { %s813_s29 = sshll.u32 %s1096_s18, 7  ;;  %s1437_s30 = sshll.u32 %s1222_s28, 3 }
  0x23   : > { %s1445_s1 = sld [smem:[#allocation17_spill]]  ;;  %s257_s12 = scalar_lea.vmem [#allocation4], %s1437_s30 }
  0x24   : > { %s264_s13 = sshll.u32 %s257_s12, 4  ;;  %p1237_p2 = pnand %p877_p13, %p1202_p8  ;;  %s1241_s13 = int_to_ptr.vmem [resolvable:$true] %s264_s13 }
  0x25   : > { %s254_s19 = scalar_lea.sflag [#allocation5], %s1222_s28 }
  0x26   : > { %p934_p6 = pneg %p1237_p2 }
  0x29   : > { %s1231_s11 = scalar_lea.hbm %s1445_s1, %s813_s29  ;;  %s937_s9 = scalar_lea.hbm %s1445_s1, 256 }
  0x2a   : > { %s932_s21 = scalar_lea.hbm %s1231_s11, 128  ;;  %p938_p8 = scmp.lt.u32.totalorder %s1231_s11, %s1445_s1 }
  0x2b   : > { %p933_p5 = scmp.ne.s32.totalorder %s1231_s11, %s932_s21  ;;  %p939_p11 = scmp.lt.u32.totalorder %s937_s9, %s932_s21 }
  0x2c   : > { %p941_p12 = scmp.lt.u32.totalorder %s932_s21, %s1231_s11 }
  0x2d   : > { %p935_p7 = pnand %p934_p6, %p933_p5  ;;  %p940_p13 = por %p939_p11, %p938_p8 }
  0x2f   : > { %p936_p10 = pneg %p935_p7  ;;  %p942_p3 = por %p941_p12, %p940_p13 }
  0x31   : > { %p943_p4 = pnand %p942_p3, %p936_p10 }
  0x33   : > { %946 = shalt.err (!%p943_p4)
}
  0x34   : > { %s947_s30 = scalar_lea.vmem %s1241_s13, 128  ;;  %s1099_s22 = smov [#allocation4]  }
  0x35   : > { %p948_p5 = scmp.ne.s32.totalorder %s1241_s13, %s947_s30  ;;  %s952_s24 = sshll.u32 %s1099_s22, 4  ;;  %s953_s24 = int_to_ptr.vmem [resolvable:$false] %s952_s24 }
  0x36   : > { %s954_s10 = scalar_lea.vmem %s953_s24, 256  ;;  %p955_p0 = scmp.lt.s32.totalorder %s1241_s13, %s953_s24 }
  0x37   : > { %p950_p7 = pnand %p948_p5, %p934_p6  ;;  %p956_p8 = scmp.lt.s32.totalorder %s954_s10, %s947_s30 }
  0x39   : > { %p951_p1 = pneg %p950_p7  ;;  %p957_p11 = por %p956_p8, %p955_p0 }
  0x3b   : > { %p958_p12 = pnand %p957_p11, %p951_p1 }
  0x3d   : > { %961 = shalt.err (!%p958_p12)
}
  0x3e   : > { %866 = dma.hbm_to_vmem [thread:$0]  (!%p1237_p2), %s1231_s11, 128, %s1241_s13, %s254_s19  }
  0x3f   : > { %p1447_p3 = scmp.lt.s32.totalorder %s1096_s18, 3  ;;  %p1448_p4 = scmp.ge.s32.totalorder %s1096_s18, 1 }
  0x40   : > { %s1284_s12 = scalar_lea.hbm %s1430_s2, %s813_s29  ;;  %s1450_s22 = sshll.u32 %s1222_s28, 3 }
  0x41   : > { %p1275_p10 = pnand %p1448_p4, %p1447_p3  ;;  %s275_s24 = scalar_lea.vmem [#allocation7], %s1450_s22 }
  0x42   : > { %s282_s10 = sshll.u32 %s275_s24, 4  ;;  %s272_s11 = scalar_lea.sflag [#allocation8], %s1222_s28  ;;  %s283_s10 = int_to_ptr.vmem [resolvable:$true] %s282_s10 }
  0x43   : > { %s1449_s21 = scalar_select %p1275_p10, 1, 0 }
  0x44   : > { %s962_s13 = scalar_lea.hbm %s1284_s12, 128  ;;  %s967_s29 = scalar_lea.hbm %s1430_s2, 256 }
  0x45   : > { %p963_p0 = scmp.ne.s32.totalorder %s1284_s12, %s962_s13  ;;  %p968_p5 = scmp.lt.u32.totalorder %s1284_s12, %s1430_s2 }
  0x46   : > { %p969_p7 = scmp.lt.u32.totalorder %s967_s29, %s962_s13  ;;  %p971_p11 = scmp.lt.u32.totalorder %s962_s13, %s1284_s12 }
  0x47   : > { %p965_p1 = pnand %p963_p0, %p934_p6 }
  0x48   : > { %p970_p8 = por %p969_p7, %p968_p5 }
  0x49   : > { %p966_p13 = pneg %p965_p1 }
  0x4a   : > { %p972_p12 = por %p971_p11, %p970_p8 }
  0x4c   : > { %p973_p3 = pnand %p972_p12, %p966_p13 }
  0x4e   : > { %976 = shalt.err (!%p973_p3)
}
  0x4f   : > { %s977_s28 = scalar_lea.vmem %s283_s10, 128  ;;  %s1100_s22 = smov [#allocation7]  }
  0x50   : > { %p978_p4 = scmp.ne.s32.totalorder %s283_s10, %s977_s28  ;;  %s982_s1 = sshll.u32 %s1100_s22, 4  ;;  %s983_s1 = int_to_ptr.vmem [resolvable:$false] %s982_s1 }
  0x51   : > { %s984_s24 = scalar_lea.vmem %s983_s1, 256  ;;  %p985_p9 = scmp.lt.s32.totalorder %s283_s10, %s983_s1 }
  0x52   : > { %p980_p0 = pnand %p978_p4, %p934_p6  ;;  %p986_p10 = scmp.lt.s32.totalorder %s984_s24, %s977_s28 }
  0x54   : > { %p981_p1 = pneg %p980_p0  ;;  %p987_p5 = por %p986_p10, %p985_p9 }
  0x56   : > { %p988_p7 = pnand %p987_p5, %p981_p1 }
  0x58   : > { %991 = shalt.err (!%p988_p7)
}
  0x59   : > { %869 = dma.hbm_to_vmem [thread:$0]  (!%p1237_p2), %s1284_s12, 128, %s283_s10, %s272_s11  }
  0x5a   : > { %p1451_p13 = scmp.ne.s32.totalorder %s1449_s21, 0 }
  0x5b   : > { %s1311_s13 = sand.u32 (!%p1451_p13), 1, %s1088_s16   ;;  %p1452_p9 = scmp.ne.s32.totalorder (!%p1451_p13), %s1442_s25, 0 }
  0x5c   : > { %291 = sbr.rel (%p1451_p13) target bundleno = 1019 (0x3fb), region = 44  ;;  %s1314_s19 = sshll.u32 (!%p1451_p13), %s1311_s13, 3 }
  0x5d   : > { %s294_s29 = scalar_lea.sflag (!%p1451_p13), [#allocation5], %s1311_s13  ;;  %s297_s30 = scalar_lea.vmem (!%p1451_p13), [#allocation4], %s1314_s19 }
  0x63   : > { %1067 = dma.done.wait (%p1452_p9), %s294_s29, 128  }
  0x64   : > { %1069 = vsyncadd (%p1452_p9), %s294_s29, 4294967168  ;;  %s303_s14 = scalar_lea.sflag [#allocation8], %s1311_s13  ;;  %s306_s21 = scalar_lea.vmem [#allocation7], %s1314_s19 }
  0x65   : > { %1071 = dma.done.wait (%p1452_p9), %s303_s14, 128  }
  0x66   : > { %1073 = vsyncadd (%p1452_p9), %s303_s14, 4294967168  ;;  %v1101_v0 = vmov 0.0   ;;  %vm1102_vm0 = vmmov 0   ;;  %v1103_v1 = vmov 0   ;;  %vm356_vm1 = vcmask 130048   ;;  %v355_v2 = vld [vmem:[%s306_s21] sm:$0xff] }
  0x67   : > { %840 = vmatprep.subr.mxu0 %v1101_v0  ;;  %845 = vmatprep.subr.mxu1 %v1101_v0  ;;  %vm433_vm2 = vcmask 261120   ;;  %v1330_v3 = vld [vmem:[%s297_s30] sm:$0xff]  ;;  %s353_s22 = sld [smem:[#allocation3 + %s1184_s0]]  ;;  %v351_v16 = vlaneseq  ;;  %vm525_vm5 = vcmask 60416   ;;  %vm576_vm6 = vcmask 1043456   ;;  %s820_s29 = sshll.u32 %s1311_s13, 2 }
  0x68   : > { %842 = vmatprep.mubr.msk.f32.mxu0 %vm1102_vm0, %v1101_v0  ;;  %847 = vmatprep.mubr.msk.f32.mxu1 %vm1102_vm0, %v1101_v0  ;;  %v348_v4 = vld [vmem:[%s1432_s4] sm:$0xf]  ;;  %s346_s30 = scalar_lea.vmem [#allocation10], %s820_s29  ;;  %vm572_vm7 = vcmask 31744   ;;  %s831_s14 = sshll.u32 %s1184_s0, 6 }
  0x69   : > { %915 = vset.pattern.permute.xlu0 %v1103_v1  ;;  %841 = vmatpush3.xpose.msk.msra.mxu0 %vm356_vm1, %v355_v2  ;;  %v347_v5 = vld [vmem:[%s1431_s3] sm:$0xf]  ;;  %v352_v17 = vand.u32 127, %v351_v16  ;;  %s684_s21 = sshll.u32 %s346_s30, 4  ;;  %s1357_s10 = scalar_lea.hbm %s1436_s8, %s831_s14  ;;  %s685_s21 = int_to_ptr.vmem [resolvable:$true] %s684_s21 }
  0x6a   : > { %846 = vmatpush3.xpose.msk.msra.mxu1 %vm433_vm2, %v1330_v3  ;;  %v349_v6 = vld [vmem:[%s1433_s5] sm:$0xf]  ;;  %850 = vmatprep.subr.mxu0 %v1101_v0  ;;  %s658_s11 = scalar_lea.sflag [#allocation11], %s1311_s13  ;;  %s992_s9 = scalar_lea.vmem %s685_s21, 64 }
  0x6b   : > { %512 = vperm.xlu0 %915, %v349_v6   ;;  %v350_v30 = vld [vmem:[%s1434_s6] sm:$0xf]  ;;  %p993_p2 = scmp.ne.s32.totalorder %s685_s21, %s992_s9  ;;  %p1453_p6 = scmp.ne.s32.totalorder %s1443_s26, 0 }
  0x6c   : > { %843 = vmatmul.mubr.msk.f32.vlgmr.msra.gmra.mrb[0].mxu0 %vm356_vm1, %v348_v4  ;;  %s1104_s28 = smov [#allocation10]  }
  0x6d   : > { %848 = vmatmul.mubr.msk.f32.vlgmr.msra.gmra.mrb[0].mxu1 %vm433_vm2, %v347_v5  ;;  %852 = vmatprep.mubr.msk.f32.mxu0 %vm1102_vm0, %v1101_v0  ;;  %v522_v18 = vstv %s353_s22  ;;  %p994_p10 = pnand %p993_p2, %p1453_p6  ;;  %s996_s22 = sshll.u32 %s1104_s28, 4  ;;  %s997_s22 = int_to_ptr.vmem [resolvable:$false] %s996_s22 }
  0x6e   : > { %vm523_vm3 = vcmp.lt.s32.totalorder %v352_v17, %v522_v18  ;;  %851 = vmatpush3.msk.msra.mxu0 %vm576_vm6, %v350_v30  ;;  %s998_s1 = scalar_lea.vmem %s997_s22, 128  ;;  %p999_p11 = scmp.lt.s32.totalorder %s685_s21, %s997_s22 }
  0x6f   : > { %p995_p8 = pneg %p994_p10  ;;  %p1000_p12 = scmp.lt.s32.totalorder %s998_s1, %s992_s9 }
  0x71   : > { %p1001_p3 = por %p1000_p12, %p999_p11 }
  0x73   : > { %p1002_p4 = pnand %p1001_p3, %p995_p8 }
  0xea   : > { %v513_v7 = vpop.permute.xlu0 %512 }
 0x13f   : > { %v429_v8 = vpop.f32.mrb[0].mxu0 }
 0x140   : > { %v506_v9 = vpop.f32.mrb[0].mxu1  ;;  %v844_v11 = vpop.f32.mrb[1].mxu0 }
 0x141   : > { %v507_v10 = vadd.f32 %v506_v9, %v429_v8  ;;  %v849_v12 = vpop.f32.mrb[1].mxu1 }
 0x143   : > { %v515_v13 = vadd.f32 %v513_v7, %v507_v10 }
 0x145   : > { %v517_v14 = vmin.f32 %v515_v13, 0.0  ;;  %vm516_vm4 = vcmp.gt.f32.partialorder %v515_v13, 0.0 }
 0x147   : > { %v518_v15 = vmul.f32 1.442695, %v517_v14 }
 0x149   : > { %916 = vpow2.f32 %v518_v15 }
 0x153   : > { %v917_v19 = vpop.eup %916 }
 0x154   : > { %v825_v20 = vadd.f32 -1.0, %v917_v19 }
 0x156   : > { %v521_v21 = vsel %vm516_vm4, %v515_v13, %v825_v20 }
 0x157   : > { %v524_v22 = vsel %vm523_vm3, %v521_v21, -inf }
 0x158   : > { %v526_v23 = vsel %vm525_vm5, %v524_v22, -inf }
 0x159   : > { %527 = vmax.xlane.f32.xlu0 %v526_v23 }
 0x1e6   : > { %v528_v24 = vpop.xlane.xlu0 %527 }
 0x1e7   : > { %v529_v25 = vmax.f32 %v528_v24, -3e+38 }
 0x1e9   : > { %v530_v26 = vsub.f32 %v524_v22, %v529_v25 }
 0x1eb   : > { %v531_v27 = vmul.f32 1.442695, %v530_v26 }
 0x1ed   : > { %918 = vpow2.f32 %v531_v27 }
 0x1f7   : > { %v919_v28 = vpop.eup %918 }
 0x1f8   : > { %v533_v29 = vsel %vm525_vm5, %v919_v28, 0.0 }
 0x1f9   : > { %534 = vadd.xlane.f32.xlu1 %v533_v29 }
 0x286   : > { %v535_v31 = vpop.xlane.xlu1 %534 }
 0x287   : > { %v536_v32 = vmax.f32 %v535_v31, 1e-30 }
 0x289   : > { %920 = vrcp.f32 %v536_v32 }
 0x293   : > { %v921_v33 = vpop.eup %920 }
 0x294   : > { %v538_v34 = vmul.f32 %v921_v33, %v919_v28 }
 0x296   : > { %540 = vxpose.xlu1.b32.start.end [1/1] (short) (narrow) %v538_v34, 8  ;;  %539 = vst.msk [vmem:[%s346_s30] sm:$0xf] %vm525_vm5, %v538_v34 }
 0x316   : > { %v556_v35 = vpop.trf.xlu1 }
 0x317   : > { %853 = vmatmul.mubr.msk.f32.vlgmr.msra.gmra.mrb[2].mxu0 %vm572_vm7, %v556_v35 }
 0x318   : > { %1005 = shalt.err (!%p1002_p4)
}
 0x319   : > { %s1006_s24 = scalar_lea.hbm %s1357_s10, 64  ;;  %s1010_s14 = scalar_lea.hbm %s1436_s8, 128 }
 0x31a   : > { %p1007_p0 = scmp.ne.s32.totalorder %s1357_s10, %s1006_s24  ;;  %p1011_p7 = scmp.lt.u32.totalorder %s1357_s10, %s1436_s8 }
 0x31b   : > { %p1012_p13 = scmp.lt.u32.totalorder %s1010_s14, %s1006_s24  ;;  %p1014_p2 = scmp.lt.u32.totalorder %s1006_s24, %s1357_s10 }
 0x31c   : > { %p1008_p1 = pnand %p1007_p0, %p1453_p6 }
 0x31d   : > { %p1013_p9 = por %p1012_p13, %p1011_p7 }
 0x31e   : > { %p1009_p5 = pneg %p1008_p1 }
 0x31f   : > { %p1015_p10 = por %p1014_p2, %p1013_p9 }
 0x321   : > { %p1016_p8 = pnand %p1015_p10, %p1009_p5 }
 0x323   : > { %1019 = shalt.err (!%p1016_p8)
}
 0x324   : > { %860 = dma.vmem_to_hbm [thread:$0]  (%p1453_p6), %s685_s21, 64, %s1357_s10, %s658_s11  }
 0x325   : > { %s830_s9 = sshll.u32 %s1184_s0, 7  ;;  %s339_s28 = scalar_lea.vmem [#allocation9], %s1314_s19 }
 0x326   : > { %s671_s22 = sshll.u32 %s339_s28, 4  ;;  %s1383_s29 = scalar_lea.hbm %s1435_s7, %s830_s9  ;;  %s1385_s22 = int_to_ptr.vmem [resolvable:$true] %s671_s22 }
 0x327   : > { %s653_s21 = scalar_lea.sflag [#allocation6], %s1311_s13  ;;  %s1020_s0 = scalar_lea.vmem %s1385_s22, 128 }
 0x328   : > { %p1021_p11 = scmp.ne.s32.totalorder %s1385_s22, %s1020_s0  ;;  %s1105_s19 = smov [#allocation9]  }
 0x329   : > { %s1024_s10 = sshll.u32 %s1105_s19, 4  ;;  %s1025_s10 = int_to_ptr.vmem [resolvable:$false] %s1024_s10 }
 0x32a   : > { %p1022_p12 = pnand %p1021_p11, %p1453_p6  ;;  %s1026_s11 = scalar_lea.vmem %s1025_s10, 256 }
 0x32b   : > { %p1027_p4 = scmp.lt.s32.totalorder %s1385_s22, %s1025_s10  ;;  %p1028_p0 = scmp.lt.s32.totalorder %s1026_s11, %s1020_s0 }
 0x32c   : > { %p1023_p3 = pneg %p1022_p12 }
 0x32d   : > { %p1029_p1 = por %p1028_p0, %p1027_p4 }
 0x32f   : > { %p1030_p5 = pnand %p1029_p1, %p1023_p3 }
 0x3ea   : > { %v646_v36 = vpop.f32.mrb[2].mxu0 }
 0x3eb   : > { %v650_v37 = vmul.f32 %v646_v36, %v1330_v3  ;;  %v854_v38 = vpop.f32.mrb[3].mxu0 }
 0x3ed   : > { %651 = vst.msk [vmem:[%s339_s28] sm:$0xff] %vm433_vm2, %v650_v37 }
 0x3ee   : > { %1033 = shalt.err (!%p1030_p5)
}
 0x3ef   : > { %s1034_s13 = scalar_lea.hbm %s1383_s29, 128  ;;  %s1038_s25 = scalar_lea.hbm %s1435_s7, 256 }
 0x3f0   : > { %p1035_p7 = scmp.ne.s32.totalorder %s1383_s29, %s1034_s13  ;;  %p1039_p2 = scmp.lt.u32.totalorder %s1383_s29, %s1435_s7 }
 0x3f1   : > { %p1040_p10 = scmp.lt.u32.totalorder %s1038_s25, %s1034_s13  ;;  %p1042_p11 = scmp.lt.u32.totalorder %s1034_s13, %s1383_s29 }
 0x3f2   : > { %p1036_p13 = pnand %p1035_p7, %p1453_p6 }
 0x3f3   : > { %p1041_p8 = por %p1040_p10, %p1039_p2 }
 0x3f4   : > { %p1037_p9 = pneg %p1036_p13 }
 0x3f5   : > { %p1043_p12 = por %p1042_p11, %p1041_p8 }
 0x3f7   : > { %p1044_p3 = pnand %p1043_p12, %p1037_p9 }
 0x3f9   : > { %1047 = shalt.err (!%p1044_p3)
}
 0x3fa   : > { %859 = dma.vmem_to_hbm [thread:$0]  (%p1453_p6), %s1385_s22, 128, %s1383_s29, %s653_s21  }
 0x3fb PF: > { %s696_s28 = sand.u32 1, %s1084_s15   ;;  %p1454_p4 = scmp.ne.s32.totalorder %s1444_s27, 0 }
 0x3fc   : > { %p1455_p0 = scmp.ge.s32.totalorder %s1096_s18, 2  ;;  %s697_s1 = scalar_lea.sflag [#allocation6], %s696_s28 }
 0x3fe   : > { %p871_p1 = pnand %p1455_p0, %p1454_p4 }
 0x400   : > { %1075 = dma.done.wait (!%p871_p1), %s697_s1, 128  }
 0x401   : > { %1077 = vsyncadd (!%p871_p1), %s697_s1, 4294967168  ;;  %s706_s24 = scalar_lea.sflag [#allocation11], %s696_s28 }
 0x402   : > { %1079 = dma.done.wait (!%p871_p1), %s706_s24, 64  }
 0x403   : > { %1081 = vsyncadd (!%p871_p1), %s706_s24, 4294967232  ;;  %p32_p6 = scmp.ge.s32.totalorder %s1188_s20, 4   ;;  %s1456_s15 = smov %s1088_s16 }
 0x404   : > { %s1457_s16 = smov %s1092_s17  ;;  %s1458_s17 = smov %s1200_s23 }
 0x405   : > { %s1459_s18 = smov %s1188_s20  ;;  %34 = sbr.rel (!%p32_p6) target bundleno = 21 (0x15), region = 119 }
 0x40c   :  { %711 = vsyncpa [#allocation5], 1 }
 0x40d   :  { %713 = vsyncpa [#allocation5 + $0x1], 1 }
 0x40e   :  { %714 = vsyncpa [#allocation8], 1 }
 0x40f   :  { %716 = vsyncpa [#allocation8 + $0x1], 1 }
 0x410   :  { %717 = vsyncpa [#allocation6], 1 }
 0x411   :  { %719 = vsyncpa [#allocation6 + $0x1], 1 }
 0x412   :  { %720 = vsyncpa [#allocation11], 1 }
 0x413   :  { %722 = vsyncpa [#allocation11 + $0x1], 1 }

</bundles_post_ra>
